<compile_context>
chip_gen: v7x
topology: tpu7x:2x2x1
jax: 0.10.0
libtpu: 0.0.40
codegen_flags: <defaults>
</compile_context>

<pallas_src>
import functools

import jax
import jax.numpy as jnp
from jax.experimental import pallas as pl
from jax.experimental.pallas import tpu as pltpu

MARGIN1 = 0.6
MARGIN2 = 0.1  # TODO(synk): wp/margin2 branch is computed-then-discarded in the reference forward; not emitted.

_FALLBACK_NEG = 100.0   # reference fallback for rows with no valid negative
_PAD_PENALTY = 1.0e4    # additive penalty that excludes padded text columns


def _round_up(x, m):
    return ((x + m - 1) // m) * m


def _hardest_negative_kernel(lab_col_ref, lab_row_ref, pad_pen_ref,
                             img_ref, txt_t_ref, out_ref):
    """Running row-wise min of masked cosine distances (the hardest negative).

    grid = (row tiles, col tiles); the column axis is the reduction axis and
    out_ref (tm, 1) is the resident accumulator (same block index across j).
    """
    j = pl.program_id(1)

    @pl.when(j == 0)
    def _():
        out_ref[...] = jnp.full(out_ref.shape, _FALLBACK_NEG, out_ref.dtype)

    # (tm, tn) cosine-similarity block on the MXU: bf16 operands, f32 accum.
    sim = jnp.einsum("id,dj->ij", img_ref[...], txt_t_ref[...],
                     preferred_element_type=jnp.float32)
    all_dist = 1.0 - sim

    # Exclude same-label columns (reference sets them to 100) and padded
    # columns (additive penalty row, nonzero only past bs).
    same = lab_col_ref[...] == lab_row_ref[...]
    cand = jnp.where(same, jnp.float32(_FALLBACK_NEG),
                     all_dist + pad_pen_ref[...])
    out_ref[...] = jnp.minimum(out_ref[...],
                               jnp.min(cand, axis=1, keepdims=True))


def _pick_tiles(bs, d, vmem_bytes):
    """Pick (tm, tn, pbs): 256-aligned MXU tiles capped by a VMEM budget."""
    pbs_small = _round_up(bs, 8)
    if pbs_small <= 512:
        # Single block per axis (block == full padded array -> (8,128) rule
        # satisfied by "equals full dim"); no text re-streaming at all.
        return pbs_small, pbs_small, pbs_small

    budget = max(vmem_bytes // 2, 24 << 20)

    def need(tm, tn):
        # double-buffered bf16 inputs + f32 sim working set + small refs
        return (4 * tm * d) + (4 * tn * d) + (3 * 4 * tm * tn) + (1 << 20)

    tm = 512
    while tm > 256 and need(tm, 256) > budget:
        tm -= 256
    tn = 512
    while tn > 256 and need(tm, tn) > budget:
        tn -= 256
    pbs = _round_up(bs, max(tm, tn))
    return tm, tn, pbs


def selective_triplets_loss(labels, img_embs, text_embs, *,
                            mxu_dtype=jnp.bfloat16):
    """labels: (bs,) int; img_embs/text_embs: (bs, D) float. Returns scalar f32."""
    bs, d = img_embs.shape

    img = img_embs.astype(jnp.float32)
    txt = text_embs.astype(jnp.float32)

    # ---- wrapper-side (fused, mem-bound XLA) preprocessing -------------------
    ni = jnp.sqrt(jnp.sum(img * img, axis=1, keepdims=True))
    nt = jnp.sqrt(jnp.sum(txt * txt, axis=1, keepdims=True))
    # F.cosine_similarity: dot / max(|a|*|b|, 1e-8)
    pos_dist = 1.0 - jnp.sum(img * txt, axis=1) / jnp.maximum(
        ni[:, 0] * nt[:, 0], 1e-8)
    # F.normalize(p=2): x / max(|x|, 1e-12)
    img_n = img / jnp.maximum(ni, 1e-12)
    txt_n = txt / jnp.maximum(nt, 1e-12)

    try:
        vmem_bytes = int(pltpu.get_tpu_info().vmem_capacity_bytes)
    except Exception:  # conservative fallback = v7x per-TC VMEM
        vmem_bytes = 64 << 20
    tm, tn, pbs = _pick_tiles(bs, d, vmem_bytes)

    pad = pbs - bs
    labels = labels.astype(jnp.int32)
    if pad:
        img_n = jnp.pad(img_n, ((0, pad), (0, 0)))
        txt_n = jnp.pad(txt_n, ((0, pad), (0, 0)))
        labels = jnp.pad(labels, (0, pad))

    lab_col = labels.reshape(pbs, 1)
    lab_row = labels.reshape(1, pbs)
    col_idx = jnp.arange(pbs, dtype=jnp.int32)
    pad_pen = jnp.where(col_idx >= bs, jnp.float32(_PAD_PENALTY),
                        jnp.float32(0.0)).reshape(1, pbs)

    img_mm = img_n.astype(mxu_dtype)        # (pbs, d)   MXU lhs
    txt_t_mm = txt_n.T.astype(mxu_dtype)    # (d, pbs)   MXU rhs, pre-transposed

    n_i, n_j = pbs // tm, pbs // tn

    est = (4 * tm * d) + (4 * tn * d) + (3 * 4 * tm * tn) + (4 << 20)
    vmem_limit = int(min(max(32 << 20, est), int(0.85 * vmem_bytes)))

    neg_min = pl.pallas_call(
        _hardest_negative_kernel,
        out_shape=jax.ShapeDtypeStruct((pbs, 1), jnp.float32),
        grid_spec=pltpu.PrefetchScalarGridSpec(
            num_scalar_prefetch=0,
            grid=(n_i, n_j),
            in_specs=[
                pl.BlockSpec((tm, 1), lambda i, j: (i, 0)),   # anchor labels
                pl.BlockSpec((1, tn), lambda i, j: (0, j)),   # candidate labels
                pl.BlockSpec((1, tn), lambda i, j: (0, j)),   # padded-col penalty
                pl.BlockSpec((tm, d), lambda i, j: (i, 0)),   # img rows (bf16)
                pl.BlockSpec((d, tn), lambda i, j: (0, j)),   # text cols (bf16, T)
            ],
            out_specs=pl.BlockSpec((tm, 1), lambda i, j: (i, 0)),
        ),
        compiler_params=pltpu.CompilerParams(
            dimension_semantics=("parallel", "arbitrary"),
            vmem_limit_bytes=vmem_limit),
    )(lab_col, lab_row, pad_pen, img_mm, txt_t_mm)

    neg_dist = neg_min[:bs, 0]
    return jnp.mean(jnp.maximum(pos_dist - neg_dist + MARGIN1, 0.0))


def _reference_loss(labels, img_embs, text_embs):
    """Pure-JAX reference mirroring the PyTorch forward (returned value only)."""
    dot = jnp.sum(img_embs * text_embs, axis=1)
    ni = jnp.linalg.norm(img_embs, axis=1)
    nt = jnp.linalg.norm(text_embs, axis=1)
    pos_dist = 1.0 - dot / jnp.maximum(ni * nt, 1e-8)
    img_n = img_embs / jnp.maximum(ni, 1e-12)[:, None]
    txt_n = text_embs / jnp.maximum(nt, 1e-12)[:, None]
    all_dist = 1.0 - img_n @ txt_n.T
    neg_mask = (labels[:, None] != labels[None, :]).astype(jnp.float32)
    neg_dist = jnp.min(all_dist * neg_mask + (1.0 - neg_mask) * 100.0, axis=1)
    return jnp.mean(jnp.maximum(pos_dist - neg_dist + MARGIN1, 0.0))


if __name__ == "__main__":
    bs, D = 8, 128
    key = jax.random.PRNGKey(0)
    k1, k2, k3 = jax.random.split(key, 3)
    labels = jax.random.randint(k1, (bs,), 0, 3, dtype=jnp.int32)
    img_embs = jax.random.normal(k2, (bs, D), dtype=jnp.float32)
    text_embs = jax.random.normal(k3, (bs, D), dtype=jnp.float32)

    ref = jax.block_until_ready(_reference_loss(labels, img_embs, text_embs))

    # f32-MXU path: tight check against the f32 reference.
    loss_f32 = jax.block_until_ready(
        selective_triplets_loss(labels, img_embs, text_embs,
                                mxu_dtype=jnp.float32))
    assert jnp.allclose(loss_f32, ref, atol=1e-5, rtol=1e-5), (loss_f32, ref)

    # default bf16-MXU path: looser tolerance (bf16 operand rounding only).
    loss_bf16 = jax.block_until_ready(
        selective_triplets_loss(labels, img_embs, text_embs))
    assert jnp.allclose(loss_bf16, ref, atol=1e-2, rtol=1e-2), (loss_bf16, ref)

    print("KERNEL_OK")
</pallas_src>

<mosaic_0001>
module attributes {stable_mosaic.version = 11 : i64} {
  func.func @_hardest_negative_kernel(%arg0: i32, %arg1: i32, %arg2: memref<8x1xi32, #tpu.memory_space<vmem>>, %arg3: memref<1x8xi32, #tpu.memory_space<vmem>>, %arg4: memref<1x8xf32, #tpu.memory_space<vmem>>, %arg5: memref<8x128xf32, #tpu.memory_space<vmem>>, %arg6: memref<128x8xf32, #tpu.memory_space<vmem>>, %arg7: memref<8x1xf32, #tpu.memory_space<vmem>>) attributes {dimension_semantics = [#tpu.dimension_semantics<parallel>, #tpu.dimension_semantics<arbitrary>], iteration_bounds = array<i64: 1, 1>, scalar_prefetch = 0 : i64, scratch_operands = 0 : i64, tpu.core_type = #tpu.core_type<tc>, window_params = [{transform_indices = @transform_0, window_bounds = array<i64: 8, 1>}, {transform_indices = @transform_1, window_bounds = array<i64: 1, 8>}, {transform_indices = @transform_2, window_bounds = array<i64: 1, 8>}, {transform_indices = @transform_3, window_bounds = array<i64: 8, 128>}, {transform_indices = @transform_4, window_bounds = array<i64: 128, 8>}, {transform_indices = @transform_5, window_bounds = array<i64: 8, 1>}]} {
    %c0_i32 = arith.constant 0 : i32
    %0 = arith.cmpi eq, %arg1, %c0_i32 : i32
    %1 = arith.extui %0 : i1 to i32
    %c0_i32_0 = arith.constant 0 : i32
    %2 = arith.cmpi ne, %1, %c0_i32_0 : i32
    scf.if %2 {
      %cst_17 = arith.constant 1.000000e+02 : f32
      %23 = vector.broadcast %cst_17 : f32 to vector<8x1xf32>
      %c0_18 = arith.constant 0 : index
      %c0_19 = arith.constant 0 : index
      %24 = vector.load %arg7[%c0_18, %c0_19] : memref<8x1xf32, #tpu.memory_space<vmem>>, vector<8x1xf32>
      tpu.vector_store %arg7[%c0_18, %c0_19], %23 {strides = array<i32>} : memref<8x1xf32, #tpu.memory_space<vmem>>, vector<8x1xf32>,
    } else {
    }
    %c0 = arith.constant 0 : index
    %c0_1 = arith.constant 0 : index
    %3 = vector.load %arg5[%c0, %c0_1] : memref<8x128xf32, #tpu.memory_space<vmem>>, vector<8x128xf32>
    %c0_2 = arith.constant 0 : index
    %c0_3 = arith.constant 0 : index
    %4 = vector.load %arg6[%c0_2, %c0_3] : memref<128x8xf32, #tpu.memory_space<vmem>>, vector<128x8xf32>
    "tpu.trace_start"() <{level = 10 : i32, message = "id,dj->ij"}> : () -> ()
    %cst = arith.constant dense<0.000000e+00> : vector<8x8xf32>
    %5 = tpu.matmul %3, %4, %cst {dimension_numbers = #tpu.dot_dimension_numbers<[1], [0], [0], [1], [0, 0, 1, 1], [], []>} : vector<8x128xf32>, vector<128x8xf32>, vector<8x8xf32> -> vector<8x8xf32>
    "tpu.trace_stop"() : () -> ()
    %cst_4 = arith.constant 1.000000e+00 : f32
    %6 = vector.broadcast %cst_4 : f32 to vector<8x8xf32>
    %7 = arith.subf %6, %5 : vector<8x8xf32>
    %c0_5 = arith.constant 0 : index
    %c0_6 = arith.constant 0 : index
    %8 = vector.load %arg2[%c0_5, %c0_6] : memref<8x1xi32, #tpu.memory_space<vmem>>, vector<8x1xi32>
    %c0_7 = arith.constant 0 : index
    %c0_8 = arith.constant 0 : index
    %9 = vector.load %arg3[%c0_7, %c0_8] : memref<1x8xi32, #tpu.memory_space<vmem>>, vector<1x8xi32>
    %10 = vector.broadcast %8 : vector<8x1xi32> to vector<8x8xi32>
    %11 = vector.broadcast %9 : vector<1x8xi32> to vector<8x8xi32>
    %12 = arith.cmpi eq, %10, %11 : vector<8x8xi32>
    %c0_9 = arith.constant 0 : index
    %c0_10 = arith.constant 0 : index
    %13 = vector.load %arg4[%c0_9, %c0_10] : memref<1x8xf32, #tpu.memory_space<vmem>>, vector<1x8xf32>
    %14 = vector.broadcast %13 : vector<1x8xf32> to vector<8x8xf32>
    %15 = arith.addf %7, %14 : vector<8x8xf32>
    %cst_11 = arith.constant 1.000000e+02 : f32
    %16 = vector.broadcast %cst_11 : f32 to vector<8x8xf32>
    %17 = arith.select %12, %16, %15 : vector<8x8xi1>, vector<8x8xf32>
    %c0_12 = arith.constant 0 : index
    %c0_13 = arith.constant 0 : index
    %18 = vector.load %arg7[%c0_12, %c0_13] : memref<8x1xf32, #tpu.memory_space<vmem>>, vector<8x1xf32>
    %cst_14 = arith.constant dense<0x7F800000> : vector<8xf32>
    %19 = vector.multi_reduction <minimumf>, %17, %cst_14 [1] : vector<8x8xf32> to vector<8xf32>
    %20 = vector.shape_cast %19 : vector<8xf32> to vector<8x1xf32>
    %21 = arith.minimumf %18, %20 : vector<8x1xf32>
    %c0_15 = arith.constant 0 : index
    %c0_16 = arith.constant 0 : index
    %22 = vector.load %arg7[%c0_15, %c0_16] : memref<8x1xf32, #tpu.memory_space<vmem>>, vector<8x1xf32>
    tpu.vector_store %arg7[%c0_15, %c0_16], %21 {strides = array<i32>} : memref<8x1xf32, #tpu.memory_space<vmem>>, vector<8x1xf32>,
    return
  }
  func.func @transform_0(%arg0: i32, %arg1: i32) -> (i32, i32) {
    %c0_i32 = arith.constant 0 : i32
    %c0_i32_0 = arith.constant 0 : i32
    return %arg0, %c0_i32 : i32, i32
  }
  func.func @transform_1(%arg0: i32, %arg1: i32) -> (i32, i32) {
    %c0_i32 = arith.constant 0 : i32
    %c0_i32_0 = arith.constant 0 : i32
    return %c0_i32, %arg1 : i32, i32
  }
  func.func @transform_2(%arg0: i32, %arg1: i32) -> (i32, i32) {
    %c0_i32 = arith.constant 0 : i32
    %c0_i32_0 = arith.constant 0 : i32
    return %c0_i32, %arg1 : i32, i32
  }
  func.func @transform_3(%arg0: i32, %arg1: i32) -> (i32, i32) {
    %c0_i32 = arith.constant 0 : i32
    %c0_i32_0 = arith.constant 0 : i32
    return %arg0, %c0_i32 : i32, i32
  }
  func.func @transform_4(%arg0: i32, %arg1: i32) -> (i32, i32) {
    %c0_i32 = arith.constant 0 : i32
    %c0_i32_0 = arith.constant 0 : i32
    return %c0_i32, %arg1 : i32, i32
  }
  func.func @transform_5(%arg0: i32, %arg1: i32) -> (i32, i32) {
    %c0_i32 = arith.constant 0 : i32
    %c0_i32_0 = arith.constant 0 : i32
    return %arg0, %c0_i32 : i32, i32
  }
}

</mosaic_0001>

<bundles_post_ra>
// kernel: tpu_custom_call.1
= control target key start
LH: loop header
LB: loop body
LE: loop exit
PB: predicated region body
PF: predicated region fallthrough
CT: control target
= control target key end

     0   :  { %v229_v0 = vmov 0.0|0.0   ;;  %vm230_vm0 = vmmov 0   ;;  %v231_v4 = vmov 0.0   ;;  %v232_v7 = vmov 0   ;;  %s335_s4 = inlined_call_operand.vmem [shape: f32[128,8], index: 4, kind: input, shape index: {}]   ;;  %s336_s0 = inlined_call_operand.vmem [shape: s32[8,1], index: 0, kind: input, shape index: {}]   ;;  %s337_s3 = inlined_call_operand.vmem [shape: f32[8,128], index: 3, kind: input, shape index: {}]   ;;  %s338_s5 = inlined_call_operand.vmem [shape: f32[8,1], index: 5, kind: output, shape index: {}]   ;;  %s339_s1 = inlined_call_operand.vmem [shape: s32[1,8], index: 1, kind: input, shape index: {}]   ;;  %s340_s2 = inlined_call_operand.vmem [shape: f32[1,8], index: 2, kind: input, shape index: {}]  }
   0x1   :  { %199 = vmatprep.subr.bf16.mxu0 %v229_v0  ;;  %v27_v1 = vld [vmem:[%s335_s4] sm:$0xff]  ;;  %v28_v2 = vld [vmem:[%s335_s4 + $0x8] sm:$0xff]  ;;  %v29_v3 = vld [vmem:[%s335_s4 + $0x10] sm:$0xff]  ;;  %196 = vmatprep.mubr.msk.f32.mxu0 %vm230_vm0, %v231_v4  ;;  %vm24_vm1 = vcmask 7168   ;;  %v233_v29 = vmov 100.0   ;;  %vm134_vm3 = vcmask 64512  }
   0x2   :  { %v200_v5 = vpack.c.bf16 %v28_v2, %v27_v1  ;;  %v30_v6 = vld [vmem:[%s335_s4 + $0x18] sm:$0xff]  ;;  %228 = vset.pattern.permute.xlu0 %v232_v7  ;;  %v31_v9 = vld [vmem:[%s335_s4 + $0x20] sm:$0xff]  ;;  %v32_v10 = vld [vmem:[%s335_s4 + $0x28] sm:$0xff]  ;;  %25 = vst.msk [vmem:[%s338_s5] sm:$0xff] %vm24_vm1, %v233_v29 }
   0x3   :  { %v203_v8 = vpack.c.bf16 %v30_v6, %v29_v3  ;;  %v114_v11 = vld [vmem:[%s336_s0] sm:$0xff]  ;;  %v206_v12 = vpack.c.bf16 %v32_v10, %v31_v9  ;;  %v33_v13 = vld [vmem:[%s335_s4 + $0x30] sm:$0xff]  ;;  %v34_v14 = vld [vmem:[%s335_s4 + $0x38] sm:$0xff] }
   0x4   :  { %201 = vmatpush3.bf16.msra.mxu0 %v200_v5  ;;  %117 = vperm.xlu0 %228, %v114_v11   ;;  %v209_v15 = vpack.c.bf16 %v34_v14, %v33_v13  ;;  %v35_v16 = vld [vmem:[%s335_s4 + $0x40] sm:$0xff]  ;;  %v36_v17 = vld [vmem:[%s335_s4 + $0x48] sm:$0xff]  ;;  %v37_v19 = vld [vmem:[%s335_s4 + $0x50] sm:$0xff] }
   0x5   :  { %202 = vmatprep.subr.bf16.mxu0 %v229_v0  ;;  %v212_v18 = vpack.c.bf16 %v36_v17, %v35_v16  ;;  %v38_v20 = vld [vmem:[%s335_s4 + $0x58] sm:$0xff]  ;;  %v39_v22 = vld [vmem:[%s335_s4 + $0x60] sm:$0xff]  ;;  %v40_v23 = vld [vmem:[%s335_s4 + $0x68] sm:$0xff] }
   0x6   :  { %v215_v21 = vpack.c.bf16 %v38_v20, %v37_v19  ;;  %v218_v24 = vpack.c.bf16 %v40_v23, %v39_v22  ;;  %v41_v25 = vld [vmem:[%s335_s4 + $0x70] sm:$0xff]  ;;  %v42_v26 = vld [vmem:[%s335_s4 + $0x78] sm:$0xff]  ;;  %v26_v28 = vld [vmem:[%s337_s3] sm:$0xff] }
   0x7   :  { %v221_v27 = vpack.c.bf16 %v42_v26, %v41_v25  ;;  %v145_v30 = vld [vmem:[%s339_s1] ss:$0 sm:$0xff] }
   0x8   :  { %204 = vmatpush3.bf16.msra.mxu0 %v203_v8  ;;  %v146_v33 = vld [vmem:[%s340_s2] ss:$0 sm:$0xff] }
   0x9   :  { %205 = vmatprep.subr.bf16.mxu0 %v229_v0  ;;  %v133_v39 = vld [vmem:[%s338_s5] sm:$0xff] }
   0xc   :  { %207 = vmatpush3.bf16.msra.mxu0 %v206_v12 }
   0xd   :  { %208 = vmatprep.subr.bf16.mxu0 %v229_v0 }
  0x10   :  { %210 = vmatpush3.bf16.msra.mxu0 %v209_v15 }
  0x11   :  { %211 = vmatprep.subr.bf16.mxu0 %v229_v0 }
  0x14   :  { %213 = vmatpush3.bf16.msra.mxu0 %v212_v18 }
  0x15   :  { %214 = vmatprep.subr.bf16.mxu0 %v229_v0 }
  0x18   :  { %216 = vmatpush3.bf16.msra.mxu0 %v215_v21 }
  0x19   :  { %217 = vmatprep.subr.bf16.mxu0 %v229_v0 }
  0x1c   :  { %219 = vmatpush3.bf16.msra.mxu0 %v218_v24 }
  0x1d   :  { %220 = vmatprep.subr.bf16.mxu0 %v229_v0 }
  0x20   :  { %222 = vmatpush3.bf16.msra.mxu0 %v221_v27 }
  0x23   :  { %197 = vmatmul.mubr.f32.vlgmr.msra.gmra.mrb[0].mxu0 %v26_v28 }
  0x83   :  { %v118_v31 = vpop.permute.xlu0 %117 }
  0x84   :  { %vm123_vm2 = vcmp.eq.s32.totalorder %v118_v31, %v145_v30 }
  0xf6   :  { %v109_v32 = vpop.f32.mrb[0].mxu0 }
  0xf7   :  { %v113_v34 = vsub.f32 1.0, %v109_v32  ;;  %v198_v35 = vpop.f32.mrb[1].mxu0 }
  0xf9   :  { %v131_v36 = vadd.f32 %v146_v33, %v113_v34 }
  0xfb   :  { %v132_v37 = vsel %vm123_vm2, 100.0, %v131_v36 }
  0xfc   :  { %v135_v38 = vsel %vm134_vm3, %v132_v37, inf }
  0xfd   :  { %136 = vmin.xlane.f32.xlu0 %v135_v38 }
 0x18a   :  { %v137_v40 = vpop.xlane.xlu0 %136 }
 0x18b   :  { %v138_v41 = vmin.f32 %v133_v39, %v137_v40 }
 0x18d   :  { %140 = vst.msk [vmem:[%s338_s5] sm:$0xff] %vm24_vm1, %v138_v41 }

</bundles_post_ra>
